<compile_context>
chip_gen: v7x
topology: tpu7x:2x2x1
jax: 0.10.0
libtpu: 0.0.40
codegen_flags: <defaults>
</compile_context>

<pallas_src>
import math

import jax
import jax.numpy as jnp
from jax.experimental import pallas as pl
from jax.experimental.pallas import tpu as pltpu


# ----------------------------------------------------------------------------
# Pallas kernel: two dense GEMMs + bias + ReLU on lane-dense tiles.
# ----------------------------------------------------------------------------
def _st_embed_kernel(x_ref, w1_ref, b1_ref, w2_ref, b2_ref, o_ref):
    h = jnp.dot(x_ref[...], w1_ref[...], preferred_element_type=jnp.float32)
    h = jnp.maximum(h + b1_ref[...], 0.0)          # bias + ReLU in f32
    h = h.astype(w2_ref.dtype)                     # back to streaming dtype for MXU
    out = jnp.dot(h, w2_ref[...], preferred_element_type=jnp.float32) + b2_ref[...]
    o_ref[...] = out.astype(o_ref.dtype)


# ----------------------------------------------------------------------------
# Host-side parameter folding (runs ONCE per parameter set, outside jit).
# ----------------------------------------------------------------------------
def _conv_band_matrix(w, T):
    """(1,K) temporal conv (torch OIHW weight (D_out, D_in, 1, K), zero pad (K-1)//2)
    as a (T*D_in, T*D_out) matrix acting on the flat (t*D + d) layout:
        y_flat = x_flat @ C   (bias handled separately)."""
    D_out, D_in, _, K = w.shape
    p = (K - 1) // 2
    C = jnp.zeros((T * D_in, T * D_out), w.dtype)
    for k in range(K):
        Wk = w[:, :, 0, k].T                      # (D_in, D_out)
        for t_out in range(T):
            t_in = t_out + k - p
            if 0 <= t_in < T:
                C = C.at[t_in * D_in:(t_in + 1) * D_in,
                         t_out * D_out:(t_out + 1) * D_out].set(Wk)
    return C


def _round_up(a, b):
    return ((a + b - 1) // b) * b


def _fold_params(params, T, compute_dtype):
    """Fold conv1 o conv2 o linear1 into one GEMM, lane-pack, pre-cast. Host side."""
    D = params["conv1_w"].shape[0]
    TD = T * D
    H = params["l1_w"].shape[0]
    d_model = params["l2_w"].shape[0]

    C1 = _conv_band_matrix(params["conv1_w"], T)           # (TD, TD)
    C2 = _conv_band_matrix(params["conv2_w"], T)           # (TD, TD)
    c1 = jnp.tile(params["conv1_b"], T)                    # (TD,)
    c2 = jnp.tile(params["conv2_b"], T)                    # (TD,)
    Wl1 = params["l1_w"].T                                  # (TD, H)
    C2Wl1 = C2 @ Wl1
    Wf1 = C1 @ C2Wl1                                        # (TD, H)
    bf1 = c1 @ C2Wl1 + c2 @ Wl1 + params["l1_b"]            # (H,)
    Wf2 = params["l2_w"].T                                  # (H, d_model)
    bf2 = params["l2_b"]                                    # (d_model,)

    # Lane-packing factor: pack r logical rows per kernel row so the output last dim
    # r*d_model is a multiple of 128 (unmasked lane-dense stores).
    r = 128 // math.gcd(128, d_model)
    if r > 16:                                              # pathological d_model
        r = 1
    dm_pad = d_model
    if (r * d_model) % 128 != 0:                            # only possible when r == 1
        dm_pad = _round_up(d_model, 128)                    # zero-pad output columns
        Wf2 = jnp.pad(Wf2, ((0, 0), (0, dm_pad - d_model)))
        bf2 = jnp.pad(bf2, (0, dm_pad - d_model))

    if r > 1:
        W1 = jnp.kron(jnp.eye(r, dtype=Wf1.dtype), Wf1)     # (r*TD, r*H) block-diag
        W2 = jnp.kron(jnp.eye(r, dtype=Wf2.dtype), Wf2)     # (r*H, r*dm_pad)
        b1 = jnp.tile(bf1, r)
        b2 = jnp.tile(bf2, r)
    else:
        W1, W2, b1, b2 = Wf1, Wf2, bf1, bf2

    weights = (
        W1.astype(compute_dtype),
        b1.reshape(1, -1).astype(jnp.float32),
        W2.astype(compute_dtype),
        b2.reshape(1, -1).astype(jnp.float32),
    )
    meta = dict(r=r, TD=TD, H=H, d_model=d_model, dm_pad=dm_pad)
    return weights, meta


# ----------------------------------------------------------------------------
# Factory: fold once, return a jitted per-call function (streaming pallas_call only).
# ----------------------------------------------------------------------------
def make_st_embedding_proj(params, history_step, *,
                           compute_dtype=jnp.bfloat16, tile_m=4096):
    """Returns apply(x): (B, N, T, D) -> (B, N, d_model)."""
    assert tile_m % 8 == 0
    (W1, b1, W2, b2), meta = _fold_params(params, history_step, compute_dtype)
    r, TD, d_model, dm_pad = meta["r"], meta["TD"], meta["d_model"], meta["dm_pad"]
    Nk = W1.shape[0]     # r*TD
    N1 = W1.shape[1]     # r*H
    N2 = W2.shape[1]     # r*dm_pad

    @jax.jit
    def apply(x):
        B, N, T_in, D_in = x.shape
        assert T_in * D_in == TD, "x shape inconsistent with folded parameters"
        out_dtype = x.dtype
        M = B * N
        Mr = -(-M // r)                                     # ceil(M / r)

        # Pack rows: (B,N,T,D) -> (Mr, r*TD). Pad only the <= r-1 rows needed to
        # reach a multiple of r (skipped in the common M % r == 0 case).
        if M % r != 0:
            xf = jnp.pad(x.reshape(M, TD), ((0, Mr * r - M), (0, 0)))
            xw = xf.reshape(Mr, Nk)
        else:
            xw = x.reshape(Mr, Nk)
        xw = xw.astype(compute_dtype)                       # no-op in the f32 path

        # Tile: large (amortize per-step overhead) but keep >= 2 grid steps when
        # possible so v7x can shard the "parallel" axis across both TensorCores.
        tile = max(8, min(tile_m, _round_up(pl.cdiv(Mr, 2), 8)))
        grid = pl.cdiv(Mr, tile)                            # ragged last block masked

        itemsize = jnp.dtype(compute_dtype).itemsize
        cost = pl.CostEstimate(
            flops=2 * Mr * (Nk * N1 + N1 * N2),
            transcendentals=0,
            bytes_accessed=(Mr * Nk * itemsize + Mr * N2 * jnp.dtype(out_dtype).itemsize
                            + (W1.size + W2.size) * itemsize + (b1.size + b2.size) * 4),
        )

        out = pl.pallas_call(
            _st_embed_kernel,
            out_shape=jax.ShapeDtypeStruct((Mr, N2), out_dtype),
            grid=(grid,),
            in_specs=[
                pl.BlockSpec((tile, Nk), lambda i: (i, 0)),
                pl.BlockSpec((Nk, N1), lambda i: (0, 0)),
                pl.BlockSpec((1, N1), lambda i: (0, 0)),
                pl.BlockSpec((N1, N2), lambda i: (0, 0)),
                pl.BlockSpec((1, N2), lambda i: (0, 0)),
            ],
            out_specs=pl.BlockSpec((tile, N2), lambda i: (i, 0)),
            compiler_params=pltpu.CompilerParams(dimension_semantics=("parallel",)),
            cost_estimate=cost,
        )(xw, W1, b1, W2, b2)

        out = out.reshape(Mr * r, dm_pad)
        if Mr * r != M:
            out = out[:M]
        if dm_pad != d_model:
            out = out[:, :d_model]
        return out.reshape(B, N, d_model)

    return apply


# ----------------------------------------------------------------------------
# Pure-JAX reference matching the PyTorch forward (NCHW conv path).
# ----------------------------------------------------------------------------
def reference(x, params):
    B, N, T, D = x.shape
    xc = jnp.transpose(x, (0, 3, 1, 2))          # (B, D, N, T)  == permute(0,3,1,2)
    for w, b in ((params["conv1_w"], params["conv1_b"]),
                 (params["conv2_w"], params["conv2_b"])):
        xc = jax.lax.conv_general_dilated(
            xc, w, window_strides=(1, 1), padding=((0, 0), (1, 1)),
            dimension_numbers=("NCHW", "OIHW", "NCHW")) + b[None, :, None, None]
    y = jnp.transpose(xc, (0, 2, 3, 1)).reshape(B, N, T * D)
    h = jnp.maximum(y @ params["l1_w"].T + params["l1_b"], 0.0)
    return h @ params["l2_w"].T + params["l2_b"]


def init_params(key, encoder_input_size, history_step, d_model, hidden_dim=32,
                kernel_size=3):
    D, T, H = encoder_input_size, history_step, hidden_dim
    ks = jax.random.split(key, 8)
    sc_conv = 1.0 / (D * kernel_size) ** 0.5
    sc_l1 = 1.0 / (T * D) ** 0.5
    sc_l2 = 1.0 / H ** 0.5
    return {
        "conv1_w": jax.random.normal(ks[0], (D, D, 1, kernel_size), jnp.float32) * sc_conv,
        "conv1_b": jax.random.normal(ks[1], (D,), jnp.float32) * sc_conv,
        "conv2_w": jax.random.normal(ks[2], (D, D, 1, kernel_size), jnp.float32) * sc_conv,
        "conv2_b": jax.random.normal(ks[3], (D,), jnp.float32) * sc_conv,
        "l1_w": jax.random.normal(ks[4], (H, T * D), jnp.float32) * sc_l1,
        "l1_b": jax.random.normal(ks[5], (H,), jnp.float32) * sc_l1,
        "l2_w": jax.random.normal(ks[6], (d_model, H), jnp.float32) * sc_l2,
        "l2_b": jax.random.normal(ks[7], (d_model,), jnp.float32) * sc_l2,
    }


if __name__ == "__main__":
    # Small shapes consistent with the module:
    B, N, T, D = 2, 16, 8, 4          # batch, nodes, history_step, encoder_input_size
    hidden_dim, d_model = 32, 32

    key = jax.random.PRNGKey(0)
    k_x, k_p = jax.random.split(key)
    x = jax.random.normal(k_x, (B, N, T, D), jnp.float32)
    params = init_params(k_p, D, T, d_model, hidden_dim)
    ref = reference(x, params)

    # 1) f32 streaming path: tight self-check of the kernel / folding itself.
    apply_f32 = make_st_embedding_proj(params, T, compute_dtype=jnp.float32)
    out_f32 = jax.block_until_ready(apply_f32(x))
    assert out_f32.shape == (B, N, d_model)
    assert jnp.allclose(out_f32, ref, rtol=1e-4, atol=1e-4), (
        f"f32 path max abs err = {float(jnp.max(jnp.abs(out_f32 - ref)))}")

    # 2) bf16 streaming path (the performance default): halves streamed bytes and uses
    #    bf16 MXU rates; accumulation stays f32. Tolerance loosened for bf16 rounding.
    apply_bf16 = make_st_embedding_proj(params, T, compute_dtype=jnp.bfloat16)
    out_bf16 = jax.block_until_ready(apply_bf16(x))
    assert out_bf16.shape == (B, N, d_model)
    assert jnp.allclose(out_bf16, ref, rtol=5e-2, atol=1e-1), (
        f"bf16 path max abs err = {float(jnp.max(jnp.abs(out_bf16 - ref)))}")

    print("KERNEL_OK")
</pallas_src>

<mosaic_0001>
module attributes {stable_mosaic.version = 11 : i64} {
  func.func @_st_embed_kernel(%arg0: i32, %arg1: memref<8x128xf32, #tpu.memory_space<vmem>>, %arg2: memref<128x128xf32, #tpu.memory_space<vmem>>, %arg3: memref<1x128xf32, #tpu.memory_space<vmem>>, %arg4: memref<128x128xf32, #tpu.memory_space<vmem>>, %arg5: memref<1x128xf32, #tpu.memory_space<vmem>>, %arg6: memref<8x128xf32, #tpu.memory_space<vmem>>) attributes {dimension_semantics = [#tpu.dimension_semantics<parallel>], iteration_bounds = array<i64: 1>, scalar_prefetch = 0 : i64, scratch_operands = 0 : i64, tpu.core_type = #tpu.core_type<tc>, window_params = [{transform_indices = @transform_0, window_bounds = array<i64: 8, 128>}, {pipeline_mode = #tpu.pipeline_mode<synchronous>, transform_indices = @transform_1, window_bounds = array<i64: 128, 128>}, {pipeline_mode = #tpu.pipeline_mode<synchronous>, transform_indices = @transform_2, window_bounds = array<i64: 1, 128>}, {pipeline_mode = #tpu.pipeline_mode<synchronous>, transform_indices = @transform_3, window_bounds = array<i64: 128, 128>}, {pipeline_mode = #tpu.pipeline_mode<synchronous>, transform_indices = @transform_4, window_bounds = array<i64: 1, 128>}, {transform_indices = @transform_5, window_bounds = array<i64: 8, 128>}]} {
    %c0 = arith.constant 0 : index
    %c0_0 = arith.constant 0 : index
    %0 = vector.load %arg1[%c0, %c0_0] : memref<8x128xf32, #tpu.memory_space<vmem>>, vector<8x128xf32>
    %c0_1 = arith.constant 0 : index
    %c0_2 = arith.constant 0 : index
    %1 = vector.load %arg2[%c0_1, %c0_2] : memref<128x128xf32, #tpu.memory_space<vmem>>, vector<128x128xf32>
    %cst = arith.constant dense<0.000000e+00> : vector<8x128xf32>
    %2 = tpu.matmul %0, %1, %cst {dimension_numbers = #tpu.dot_dimension_numbers<[1], [0], [0], [1], [0, 0, 1, 1], [], []>} : vector<8x128xf32>, vector<128x128xf32>, vector<8x128xf32> -> vector<8x128xf32>
    %c0_3 = arith.constant 0 : index
    %c0_4 = arith.constant 0 : index
    %3 = vector.load %arg3[%c0_3, %c0_4] : memref<1x128xf32, #tpu.memory_space<vmem>>, vector<1x128xf32>
    %4 = vector.broadcast %3 : vector<1x128xf32> to vector<8x128xf32>
    %5 = arith.addf %2, %4 : vector<8x128xf32>
    %cst_5 = arith.constant 0.000000e+00 : f32
    %6 = vector.broadcast %cst_5 : f32 to vector<8x128xf32>
    %7 = arith.maximumf %5, %6 : vector<8x128xf32>
    %c0_6 = arith.constant 0 : index
    %c0_7 = arith.constant 0 : index
    %8 = vector.load %arg4[%c0_6, %c0_7] : memref<128x128xf32, #tpu.memory_space<vmem>>, vector<128x128xf32>
    %cst_8 = arith.constant dense<0.000000e+00> : vector<8x128xf32>
    %9 = tpu.matmul %7, %8, %cst_8 {dimension_numbers = #tpu.dot_dimension_numbers<[1], [0], [0], [1], [0, 0, 1, 1], [], []>} : vector<8x128xf32>, vector<128x128xf32>, vector<8x128xf32> -> vector<8x128xf32>
    %c0_9 = arith.constant 0 : index
    %c0_10 = arith.constant 0 : index
    %10 = vector.load %arg5[%c0_9, %c0_10] : memref<1x128xf32, #tpu.memory_space<vmem>>, vector<1x128xf32>
    %11 = vector.broadcast %10 : vector<1x128xf32> to vector<8x128xf32>
    %12 = arith.addf %9, %11 : vector<8x128xf32>
    %c0_11 = arith.constant 0 : index
    %c0_12 = arith.constant 0 : index
    %13 = vector.load %arg6[%c0_11, %c0_12] : memref<8x128xf32, #tpu.memory_space<vmem>>, vector<8x128xf32>
    tpu.vector_store %arg6[%c0_11, %c0_12], %12 {strides = array<i32>} : memref<8x128xf32, #tpu.memory_space<vmem>>, vector<8x128xf32>,
    return
  }
  func.func @transform_0(%arg0: i32) -> (i32, i32) {
    %c0_i32 = arith.constant 0 : i32
    %c0_i32_0 = arith.constant 0 : i32
    return %arg0, %c0_i32 : i32, i32
  }
  func.func @transform_1(%arg0: i32) -> (i32, i32) {
    %c0_i32 = arith.constant 0 : i32
    %c0_i32_0 = arith.constant 0 : i32
    %c0_i32_1 = arith.constant 0 : i32
    return %c0_i32, %c0_i32_0 : i32, i32
  }
  func.func @transform_2(%arg0: i32) -> (i32, i32) {
    %c0_i32 = arith.constant 0 : i32
    %c0_i32_0 = arith.constant 0 : i32
    %c0_i32_1 = arith.constant 0 : i32
    return %c0_i32, %c0_i32_0 : i32, i32
  }
  func.func @transform_3(%arg0: i32) -> (i32, i32) {
    %c0_i32 = arith.constant 0 : i32
    %c0_i32_0 = arith.constant 0 : i32
    %c0_i32_1 = arith.constant 0 : i32
    return %c0_i32, %c0_i32_0 : i32, i32
  }
  func.func @transform_4(%arg0: i32) -> (i32, i32) {
    %c0_i32 = arith.constant 0 : i32
    %c0_i32_0 = arith.constant 0 : i32
    %c0_i32_1 = arith.constant 0 : i32
    return %c0_i32, %c0_i32_0 : i32, i32
  }
  func.func @transform_5(%arg0: i32) -> (i32, i32) {
    %c0_i32 = arith.constant 0 : i32
    %c0_i32_0 = arith.constant 0 : i32
    return %arg0, %c0_i32 : i32, i32
  }
}

</mosaic_0001>

<bundles_post_ra>
// kernel: apply.1
= control target key start
LH: loop header
LB: loop body
LE: loop exit
PB: predicated region body
PF: predicated region fallthrough
CT: control target
= control target key end

     0   :  { %v370_v0 = vmov 0.0|0.0   ;;  %vm371_vm0 = vmmov 0   ;;  %v372_v4 = vmov 0.0   ;;  %s527_s1 = inlined_call_operand.vmem [shape: f32[128,128], index: 1, kind: input, shape index: {}]   ;;  %s528_s3 = inlined_call_operand.vmem [shape: f32[128,128], index: 3, kind: input, shape index: {}]   ;;  %s529_s0 = inlined_call_operand.vmem [shape: f32[8,128], index: 0, kind: input, shape index: {}]   ;;  %s530_s2 = inlined_call_operand.vmem [shape: f32[1,128], index: 2, kind: input, shape index: {}]   ;;  %s531_s4 = inlined_call_operand.vmem [shape: f32[1,128], index: 4, kind: input, shape index: {}]   ;;  %s532_s5 = inlined_call_operand.vmem [shape: f32[8,128], index: 5, kind: output, shape index: {}]  }
   0x1   :  { %319 = vmatprep.subr.bf16.mxu0 %v370_v0  ;;  %v21_v1 = vld [vmem:[%s527_s1] sm:$0xff]  ;;  %v22_v2 = vld [vmem:[%s527_s1 + $0x8] sm:$0xff]  ;;  %v23_v3 = vld [vmem:[%s527_s1 + $0x10] sm:$0xff]  ;;  %281 = vmatprep.mubr.msk.f32.mxu0 %vm371_vm0, %v372_v4 }
   0x2   :  { %v320_v5 = vpack.c.bf16 %v22_v2, %v21_v1  ;;  %v24_v6 = vld [vmem:[%s527_s1 + $0x18] sm:$0xff]  ;;  %343 = vmatprep.subr.bf16.mxu1 %v370_v0  ;;  %316 = vmatprep.mubr.msk.f32.mxu1 %vm371_vm0, %v372_v4  ;;  %v25_v8 = vld [vmem:[%s527_s1 + $0x20] sm:$0xff]  ;;  %v26_v9 = vld [vmem:[%s527_s1 + $0x28] sm:$0xff] }
   0x3   :  { %v323_v7 = vpack.c.bf16 %v24_v6, %v23_v3  ;;  %v115_v10 = vld [vmem:[%s528_s3] sm:$0xff]  ;;  %v116_v11 = vld [vmem:[%s528_s3 + $0x8] sm:$0xff]  ;;  %v117_v12 = vld [vmem:[%s528_s3 + $0x10] sm:$0xff]  ;;  %v326_v14 = vpack.c.bf16 %v26_v9, %v25_v8 }
   0x4   :  { %321 = vmatpush3.bf16.msra.mxu0 %v320_v5  ;;  %v118_v13 = vld [vmem:[%s528_s3 + $0x18] sm:$0xff]  ;;  %v344_v15 = vpack.c.bf16 %v116_v11, %v115_v10  ;;  %v27_v16 = vld [vmem:[%s527_s1 + $0x30] sm:$0xff]  ;;  %v119_v19 = vld [vmem:[%s528_s3 + $0x20] sm:$0xff] }
   0x5   :  { %322 = vmatprep.subr.bf16.mxu0 %v370_v0  ;;  %v28_v17 = vld [vmem:[%s527_s1 + $0x38] sm:$0xff]  ;;  %v347_v18 = vpack.c.bf16 %v118_v13, %v117_v12  ;;  %v120_v20 = vld [vmem:[%s528_s3 + $0x28] sm:$0xff]  ;;  %v29_v22 = vld [vmem:[%s527_s1 + $0x40] sm:$0xff] }
   0x6   :  { %345 = vmatpush3.bf16.msra.mxu1 %v344_v15  ;;  %v329_v21 = vpack.c.bf16 %v28_v17, %v27_v16  ;;  %v30_v23 = vld [vmem:[%s527_s1 + $0x48] sm:$0xff]  ;;  %v350_v24 = vpack.c.bf16 %v120_v20, %v119_v19  ;;  %v121_v25 = vld [vmem:[%s528_s3 + $0x30] sm:$0xff]  ;;  %v122_v26 = vld [vmem:[%s528_s3 + $0x38] sm:$0xff] }
   0x7   :  { %346 = vmatprep.subr.bf16.mxu1 %v370_v0  ;;  %v332_v27 = vpack.c.bf16 %v30_v23, %v29_v22  ;;  %v31_v28 = vld [vmem:[%s527_s1 + $0x50] sm:$0xff]  ;;  %v32_v29 = vld [vmem:[%s527_s1 + $0x58] sm:$0xff]  ;;  %v353_v30 = vpack.c.bf16 %v122_v26, %v121_v25  ;;  %v123_v31 = vld [vmem:[%s528_s3 + $0x40] sm:$0xff] }
   0x8   :  { %324 = vmatpush3.bf16.msra.mxu0 %v323_v7  ;;  %v124_v32 = vld [vmem:[%s528_s3 + $0x48] sm:$0xff]  ;;  %v335_v33 = vpack.c.bf16 %v32_v29, %v31_v28  ;;  %v33_v34 = vld [vmem:[%s527_s1 + $0x60] sm:$0xff]  ;;  %v125_v37 = vld [vmem:[%s528_s3 + $0x50] sm:$0xff] }
   0x9   :  { %325 = vmatprep.subr.bf16.mxu0 %v370_v0  ;;  %v34_v35 = vld [vmem:[%s527_s1 + $0x68] sm:$0xff]  ;;  %v356_v36 = vpack.c.bf16 %v124_v32, %v123_v31  ;;  %v126_v38 = vld [vmem:[%s528_s3 + $0x58] sm:$0xff]  ;;  %v35_v40 = vld [vmem:[%s527_s1 + $0x70] sm:$0xff] }
   0xa   :  { %348 = vmatpush3.bf16.msra.mxu1 %v347_v18  ;;  %v338_v39 = vpack.c.bf16 %v34_v35, %v33_v34  ;;  %v36_v41 = vld [vmem:[%s527_s1 + $0x78] sm:$0xff]  ;;  %v359_v42 = vpack.c.bf16 %v126_v38, %v125_v37  ;;  %v127_v43 = vld [vmem:[%s528_s3 + $0x60] sm:$0xff]  ;;  %v128_v44 = vld [vmem:[%s528_s3 + $0x68] sm:$0xff] }
   0xb   :  { %349 = vmatprep.subr.bf16.mxu1 %v370_v0  ;;  %v341_v45 = vpack.c.bf16 %v36_v41, %v35_v40  ;;  %v362_v46 = vpack.c.bf16 %v128_v44, %v127_v43  ;;  %v20_v47 = vld [vmem:[%s529_s0] sm:$0xff]  ;;  %v129_v48 = vld [vmem:[%s528_s3 + $0x70] sm:$0xff]  ;;  %v130_v49 = vld [vmem:[%s528_s3 + $0x78] sm:$0xff] }
   0xc   :  { %327 = vmatpush3.bf16.msra.mxu0 %v326_v14  ;;  %v365_v50 = vpack.c.bf16 %v130_v49, %v129_v48  ;;  %v213_v51 = vld [vmem:[%s530_s2] ss:$0 sm:$0xff] }
   0xd   :  { %328 = vmatprep.subr.bf16.mxu0 %v370_v0  ;;  %v214_v56 = vld [vmem:[%s531_s4] ss:$0 sm:$0xff] }
   0xe   :  { %351 = vmatpush3.bf16.msra.mxu1 %v350_v24 }
   0xf   :  { %352 = vmatprep.subr.bf16.mxu1 %v370_v0 }
  0x10   :  { %330 = vmatpush3.bf16.msra.mxu0 %v329_v21 }
  0x11   :  { %331 = vmatprep.subr.bf16.mxu0 %v370_v0 }
  0x12   :  { %354 = vmatpush3.bf16.msra.mxu1 %v353_v30 }
  0x13   :  { %355 = vmatprep.subr.bf16.mxu1 %v370_v0 }
  0x14   :  { %333 = vmatpush3.bf16.msra.mxu0 %v332_v27 }
  0x15   :  { %334 = vmatprep.subr.bf16.mxu0 %v370_v0 }
  0x16   :  { %357 = vmatpush3.bf16.msra.mxu1 %v356_v36 }
  0x17   :  { %358 = vmatprep.subr.bf16.mxu1 %v370_v0 }
  0x18   :  { %336 = vmatpush3.bf16.msra.mxu0 %v335_v33 }
  0x19   :  { %337 = vmatprep.subr.bf16.mxu0 %v370_v0 }
  0x1a   :  { %360 = vmatpush3.bf16.msra.mxu1 %v359_v42 }
  0x1b   :  { %361 = vmatprep.subr.bf16.mxu1 %v370_v0 }
  0x1c   :  { %339 = vmatpush3.bf16.msra.mxu0 %v338_v39 }
  0x1d   :  { %340 = vmatprep.subr.bf16.mxu0 %v370_v0 }
  0x1e   :  { %363 = vmatpush3.bf16.msra.mxu1 %v362_v46 }
  0x1f   :  { %364 = vmatprep.subr.bf16.mxu1 %v370_v0 }
  0x20   :  { %342 = vmatpush3.bf16.msra.mxu0 %v341_v45 }
  0x22   :  { %366 = vmatpush3.bf16.msra.mxu1 %v365_v50 }
  0x23   :  { %282 = vmatmul.mubr.f32.vlgmr.msra.gmra.mrb[0].mxu0 %v20_v47 }
  0xf6   :  { %v110_v52 = vpop.f32.mrb[0].mxu0 }
  0xf7   :  { %v111_v53 = vadd.f32 %v213_v51, %v110_v52  ;;  %v283_v54 = vpop.f32.mrb[1].mxu0 }
  0xf9   :  { %v114_v55 = vmax.f32 %v111_v53, 0.0 }
  0xfb   :  { %317 = vmatmul.mubr.f32.vlgmr.msra.gmra.mrb[0].mxu1 %v114_v55 }
 0x1ce   :  { %v204_v57 = vpop.f32.mrb[0].mxu1 }
 0x1cf   :  { %v205_v58 = vadd.f32 %v214_v56, %v204_v57  ;;  %v318_v59 = vpop.f32.mrb[1].mxu1 }
 0x1d1   :  { %208 = vst [vmem:[%s532_s5] sm:$0xff] %v205_v58 }

</bundles_post_ra>
